<compile_context>
chip_gen: v6e
topology: v6e:2x2x1
jax: 0.10.0
libtpu: 0.0.40
codegen_flags: <defaults>
</compile_context>

<pallas_src>
import jax
import jax.numpy as jnp
from jax import lax
from jax.experimental import pallas as pl
from jax.experimental.pallas import tpu as pltpu


def _reg_loss_kernel(feat_ref,    # VMEM (D, tile_hw)  feat dtype  (streamed tile)
                     ind_ref,     # VMEM (1, K_pad)    int32
                     mask_ref,    # VMEM (1, K_pad)    f32 (0/1, zero-padded)
                     target_ref,  # VMEM (D, K_pad)    f32 (zero-padded)
                     out_ref,     # VMEM (1, 1)        f32 per-batch partial loss
                     pred_acc):   # VMEM (D, K_pad)    f32 scratch accumulator
    j = pl.program_id(1)
    tile_hw = feat_ref.shape[1]
    k_pad = ind_ref.shape[1]

    @pl.when(j == 0)
    def _():
        pred_acc[...] = jnp.zeros_like(pred_acc)

    # One-hot gather on the MXU: each valid index matches exactly one spatial
    # position across all HW tiles, so accumulating picks out feat[:, ind[k]].
    hw_base = j * tile_hw
    pos = lax.broadcasted_iota(jnp.int32, (tile_hw, k_pad), 0) + hw_base
    f = feat_ref[...]
    onehot = (pos == ind_ref[...]).astype(f.dtype)          # (tile_hw, K_pad)
    pred_acc[...] += jnp.dot(f, onehot, preferred_element_type=jnp.float32)

    @pl.when(j == pl.num_programs(1) - 1)
    def _():
        m = mask_ref[...]                                    # broadcasts over D
        diff = (pred_acc[...] - target_ref[...]) * m         # exact for 0/1 mask
        ad = jnp.abs(diff)
        sl1 = jnp.where(ad < 1.0, 0.5 * diff * diff, ad - 0.5)
        out_ref[...] = jnp.sum(sl1).reshape(1, 1)


def reg_loss(output, mask, ind, target, *, max_tile_hw=2048):
    """output: (B, D, H, W) NCHW; mask: (B, K); ind: (B, K) int; target: (B, K, D)."""
    B, D, H, W = output.shape
    K = ind.shape[1]
    HW = H * W

    feat = output.reshape(B, D, HW)            # free contiguous reshape, stays NCHW

    # Lane-pad the object axis to a multiple of 128; padded slots are inert
    # (ind = -1 never matches any position, mask = 0 kills any contribution).
    K_pad = ((K + 127) // 128) * 128
    ind_i32 = jnp.clip(ind.astype(jnp.int32), 0, HW - 1)    # hoisted out of the kernel
    ind_p = jnp.full((B, 1, K_pad), -1, dtype=jnp.int32).at[:, 0, :K].set(ind_i32)
    mask_f = mask.astype(jnp.float32)
    mask_p = jnp.zeros((B, 1, K_pad), jnp.float32).at[:, 0, :K].set(mask_f)
    target_p = jnp.zeros((B, D, K_pad), jnp.float32).at[:, :, :K].set(
        jnp.transpose(target.astype(jnp.float32), (0, 2, 1)))

    # HW tile: largest divisor of HW that is a multiple of 128 and <= max_tile_hw
    # (keeps the double-buffered feat tile small enough for v7x's 64 MiB VMEM).
    tile_hw = HW
    if HW % 128 == 0:
        t = min(max_tile_hw, HW)
        t -= t % 128
        while t >= 128:
            if HW % t == 0:
                tile_hw = t
                break
            t -= 128
    n_hw = HW // tile_hw

    itemsize = jnp.dtype(feat.dtype).itemsize
    cost = pl.CostEstimate(
        flops=2 * B * D * HW * K_pad + 6 * B * D * K_pad,
        transcendentals=0,
        bytes_accessed=B * D * HW * itemsize + B * (D + 2) * K_pad * 4 + B * 4,
    )

    partial = pl.pallas_call(
        _reg_loss_kernel,
        out_shape=jax.ShapeDtypeStruct((B, 1, 1), jnp.float32),
        grid_spec=pltpu.PrefetchScalarGridSpec(
            num_scalar_prefetch=0,
            grid=(B, n_hw),
            in_specs=[
                pl.BlockSpec((None, D, tile_hw), lambda b, j: (b, 0, j)),  # feat[b] tile
                pl.BlockSpec((None, 1, K_pad), lambda b, j: (b, 0, 0)),    # ind[b]
                pl.BlockSpec((None, 1, K_pad), lambda b, j: (b, 0, 0)),    # mask[b]
                pl.BlockSpec((None, D, K_pad), lambda b, j: (b, 0, 0)),    # target[b]
            ],
            out_specs=pl.BlockSpec((None, 1, 1), lambda b, j: (b, 0, 0)),
            scratch_shapes=[pltpu.VMEM((D, K_pad), jnp.float32)],
        ),
        compiler_params=pltpu.CompilerParams(
            dimension_semantics=("parallel", "arbitrary")),
        cost_estimate=cost,
    )(feat, ind_p, mask_p, target_p)

    num = jnp.sum(mask_f)
    return jnp.sum(partial) / (num + 0.0001)


def _reg_loss_ref(output, mask, ind, target):
    """Pure-JAX reference matching the PyTorch RegLoss semantics (smooth-L1, sum)."""
    B, D, H, W = output.shape
    feat = jnp.transpose(output, (0, 2, 3, 1)).reshape(B, H * W, D)
    pred = jnp.take_along_axis(feat, ind[..., None].astype(jnp.int32), axis=1)
    num = jnp.sum(mask.astype(jnp.float32))
    m = mask.astype(jnp.float32)[..., None]
    p = pred * m
    g = target * m
    diff = p - g
    ad = jnp.abs(diff)
    sl1 = jnp.where(ad < 1.0, 0.5 * diff * diff, ad - 0.5)
    return jnp.sum(sl1) / (num + 0.0001)


if __name__ == "__main__":
    key = jax.random.PRNGKey(0)
    k1, k2, k3, k4 = jax.random.split(key, 4)

    B, D, H, W = 2, 4, 16, 16
    K = 8  # max_objects

    output = jax.random.normal(k1, (B, D, H, W), dtype=jnp.float32) * 2.0
    target = jax.random.normal(k2, (B, K, D), dtype=jnp.float32)
    ind = jax.random.randint(k3, (B, K), 0, H * W, dtype=jnp.int32)
    mask = (jax.random.uniform(k4, (B, K)) > 0.3).astype(jnp.float32)

    loss = reg_loss(output, mask, ind, target)
    jax.block_until_ready(loss)

    ref = _reg_loss_ref(output, mask, ind, target)
    assert jnp.allclose(loss, ref, rtol=1e-5, atol=1e-5), (loss, ref)

    print("KERNEL_OK")
</pallas_src>

<mosaic_0001>
module attributes {stable_mosaic.version = 11 : i64} {
  func.func @_reg_loss_kernel(%arg0: i32, %arg1: i32, %arg2: memref<1x4x256xf32, #tpu.memory_space<vmem>>, %arg3: memref<1x1x128xi32, #tpu.memory_space<vmem>>, %arg4: memref<1x1x128xf32, #tpu.memory_space<vmem>>, %arg5: memref<1x4x128xf32, #tpu.memory_space<vmem>>, %arg6: memref<1x1x1xf32, #tpu.memory_space<vmem>>, %arg7: memref<4x128xf32, #tpu.memory_space<vmem>>) attributes {dimension_semantics = [#tpu.dimension_semantics<parallel>, #tpu.dimension_semantics<arbitrary>], iteration_bounds = array<i64: 2, 1>, scalar_prefetch = 0 : i64, scratch_operands = 1 : i64, tpu.core_type = #tpu.core_type<tc>, window_params = [{transform_indices = @transform_0, window_bounds = array<i64: 1, 4, 256>}, {transform_indices = @transform_1, window_bounds = array<i64: 1, 1, 128>}, {transform_indices = @transform_2, window_bounds = array<i64: 1, 1, 128>}, {transform_indices = @transform_3, window_bounds = array<i64: 1, 4, 128>}, {transform_indices = @transform_4, window_bounds = array<i64: 1, 1, 1>}]} {
    %c0_i32 = arith.constant 0 : i32
    %0 = arith.cmpi eq, %arg1, %c0_i32 : i32
    %1 = arith.extui %0 : i1 to i32
    %c0_i32_0 = arith.constant 0 : i32
    %2 = arith.cmpi ne, %1, %c0_i32_0 : i32
    scf.if %2 {
      %cst_12 = arith.constant 0.000000e+00 : f32
      %22 = vector.broadcast %cst_12 : f32 to vector<4x128xf32>
      %c0_13 = arith.constant 0 : index
      %c0_14 = arith.constant 0 : index
      %23 = vector.load %arg7[%c0_13, %c0_14] : memref<4x128xf32, #tpu.memory_space<vmem>>, vector<4x128xf32>
      tpu.vector_store %arg7[%c0_13, %c0_14], %22 {strides = array<i32>} : memref<4x128xf32, #tpu.memory_space<vmem>>, vector<4x128xf32>,
    } else {
    }
    %c256_i32 = arith.constant 256 : i32
    %3 = arith.muli %arg1, %c256_i32 : i32
    %4 = tpu.iota {dimensions = array<i32: 0>} : vector<256x128xi32>
    %5 = vector.broadcast %3 : i32 to vector<256x128xi32>
    %6 = arith.addi %4, %5 : vector<256x128xi32>
    %c0 = arith.constant 0 : index
    %c0_1 = arith.constant 0 : index
    %c0_2 = arith.constant 0 : index
    %7 = vector.load %arg2[%c0, %c0_1, %c0_2] : memref<1x4x256xf32, #tpu.memory_space<vmem>>, vector<1x4x256xf32>
    %8 = vector.shape_cast %7 : vector<1x4x256xf32> to vector<4x256xf32>
    %c0_3 = arith.constant 0 : index
    %c0_4 = arith.constant 0 : index
    %c0_5 = arith.constant 0 : index
    %9 = vector.load %arg3[%c0_3, %c0_4, %c0_5] : memref<1x1x128xi32, #tpu.memory_space<vmem>>, vector<1x1x128xi32>
    %10 = vector.shape_cast %9 : vector<1x1x128xi32> to vector<1x128xi32>
    %11 = vector.broadcast %10 : vector<1x128xi32> to vector<256x128xi32>
    %12 = arith.cmpi eq, %6, %11 : vector<256x128xi32>
    %13 = arith.extui %12 : vector<256x128xi1> to vector<256x128xi32>
    %14 = arith.sitofp %13 : vector<256x128xi32> to vector<256x128xf32>
    %c0_6 = arith.constant 0 : index
    %c0_7 = arith.constant 0 : index
    %15 = vector.load %arg7[%c0_6, %c0_7] : memref<4x128xf32, #tpu.memory_space<vmem>>, vector<4x128xf32>
    %cst = arith.constant dense<0.000000e+00> : vector<4x128xf32>
    %16 = tpu.matmul %8, %14, %cst {dimension_numbers = #tpu.dot_dimension_numbers<[1], [0], [0], [1], [0, 0, 1, 1], [], []>} : vector<4x256xf32>, vector<256x128xf32>, vector<4x128xf32> -> vector<4x128xf32>
    %17 = arith.addf %15, %16 : vector<4x128xf32>
    %c0_8 = arith.constant 0 : index
    %c0_9 = arith.constant 0 : index
    %18 = vector.load %arg7[%c0_8, %c0_9] : memref<4x128xf32, #tpu.memory_space<vmem>>, vector<4x128xf32>
    tpu.vector_store %arg7[%c0_8, %c0_9], %17 {strides = array<i32>} : memref<4x128xf32, #tpu.memory_space<vmem>>, vector<4x128xf32>,
    %c0_i32_10 = arith.constant 0 : i32
    %19 = arith.cmpi eq, %arg1, %c0_i32_10 : i32
    %20 = arith.extui %19 : i1 to i32
    %c0_i32_11 = arith.constant 0 : i32
    %21 = arith.cmpi ne, %20, %c0_i32_11 : i32
    scf.if %21 {
      %c0_12 = arith.constant 0 : index
      %c0_13 = arith.constant 0 : index
      %c0_14 = arith.constant 0 : index
      %22 = vector.load %arg4[%c0_12, %c0_13, %c0_14] : memref<1x1x128xf32, #tpu.memory_space<vmem>>, vector<1x1x128xf32>
      %23 = vector.shape_cast %22 : vector<1x1x128xf32> to vector<1x128xf32>
      %c0_15 = arith.constant 0 : index
      %c0_16 = arith.constant 0 : index
      %24 = vector.load %arg7[%c0_15, %c0_16] : memref<4x128xf32, #tpu.memory_space<vmem>>, vector<4x128xf32>
      %c0_17 = arith.constant 0 : index
      %c0_18 = arith.constant 0 : index
      %c0_19 = arith.constant 0 : index
      %25 = vector.load %arg5[%c0_17, %c0_18, %c0_19] : memref<1x4x128xf32, #tpu.memory_space<vmem>>, vector<1x4x128xf32>
      %26 = vector.shape_cast %25 : vector<1x4x128xf32> to vector<4x128xf32>
      %27 = arith.subf %24, %26 : vector<4x128xf32>
      %28 = vector.broadcast %23 : vector<1x128xf32> to vector<4x128xf32>
      %29 = arith.mulf %27, %28 : vector<4x128xf32>
      %30 = math.absf %29 : vector<4x128xf32>
      %cst_20 = arith.constant 1.000000e+00 : f32
      %31 = vector.broadcast %cst_20 : f32 to vector<4x128xf32>
      %32 = arith.cmpf olt, %30, %31 : vector<4x128xf32>
      %cst_21 = arith.constant 5.000000e-01 : f32
      %33 = vector.broadcast %cst_21 : f32 to vector<4x128xf32>
      %34 = arith.mulf %33, %29 : vector<4x128xf32>
      %35 = arith.mulf %34, %29 : vector<4x128xf32>
      %cst_22 = arith.constant 5.000000e-01 : f32
      %36 = vector.broadcast %cst_22 : f32 to vector<4x128xf32>
      %37 = arith.subf %30, %36 : vector<4x128xf32>
      %38 = arith.select %32, %35, %37 : vector<4x128xi1>, vector<4x128xf32>
      %39 = vector.shape_cast %38 : vector<4x128xf32> to vector<1x4x128xf32>
      %cst_23 = arith.constant dense<0.000000e+00> : vector<1xf32>
      %40 = vector.multi_reduction <add>, %39, %cst_23 [1, 2] : vector<1x4x128xf32> to vector<1xf32>
      %41 = vector.shape_cast %40 : vector<1xf32> to vector<1x1x1xf32>
      %42 = vector.extract %41[0, 0, 0] : f32 from vector<1x1x1xf32>
      %43 = vector.broadcast %42 : f32 to vector<1x1xf32>
      %c0_24 = arith.constant 0 : index
      %c0_25 = arith.constant 0 : index
      %c0_26 = arith.constant 0 : index
      %44 = vector.load %arg6[%c0_24, %c0_25, %c0_26] : memref<1x1x1xf32, #tpu.memory_space<vmem>>, vector<1x1x1xf32>
      %45 = vector.shape_cast %44 : vector<1x1x1xf32> to vector<1x1xf32>
      %46 = vector.shape_cast %43 : vector<1x1xf32> to vector<1x1x1xf32>
      tpu.vector_store %arg6[%c0_24, %c0_25, %c0_26], %46 {strides = array<i32>} : memref<1x1x1xf32, #tpu.memory_space<vmem>>, vector<1x1x1xf32>,
    } else {
    }
    return
  }
  func.func @transform_0(%arg0: i32, %arg1: i32) -> (i32, i32, i32) {
    %c0_i32 = arith.constant 0 : i32
    %c0_i32_0 = arith.constant 0 : i32
    return %arg0, %c0_i32, %arg1 : i32, i32, i32
  }
  func.func @transform_1(%arg0: i32, %arg1: i32) -> (i32, i32, i32) {
    %c0_i32 = arith.constant 0 : i32
    %c0_i32_0 = arith.constant 0 : i32
    %c0_i32_1 = arith.constant 0 : i32
    return %arg0, %c0_i32, %c0_i32_0 : i32, i32, i32
  }
  func.func @transform_2(%arg0: i32, %arg1: i32) -> (i32, i32, i32) {
    %c0_i32 = arith.constant 0 : i32
    %c0_i32_0 = arith.constant 0 : i32
    %c0_i32_1 = arith.constant 0 : i32
    return %arg0, %c0_i32, %c0_i32_0 : i32, i32, i32
  }
  func.func @transform_3(%arg0: i32, %arg1: i32) -> (i32, i32, i32) {
    %c0_i32 = arith.constant 0 : i32
    %c0_i32_0 = arith.constant 0 : i32
    %c0_i32_1 = arith.constant 0 : i32
    return %arg0, %c0_i32, %c0_i32_0 : i32, i32, i32
  }
  func.func @transform_4(%arg0: i32, %arg1: i32) -> (i32, i32, i32) {
    %c0_i32 = arith.constant 0 : i32
    %c0_i32_0 = arith.constant 0 : i32
    %c0_i32_1 = arith.constant 0 : i32
    return %arg0, %c0_i32, %c0_i32_0 : i32, i32, i32
  }
}

</mosaic_0001>

<bundles_post_ra>
// kernel: tpu_custom_call.1
= control target key start
LH: loop header
LB: loop body
LE: loop exit
PB: predicated region body
PF: predicated region fallthrough
CT: control target
= control target key end

     0   :  { %9 = vsyncpa [#allocation4], 0  ;;  %s1329_s0 = inlined_call_operand.hbm [shape: f32[2,4,256], index: 0, kind: input, shape index: {}]   ;;  %s1330_s1 = inlined_call_operand.hbm [shape: s32[2,1,128], index: 1, kind: input, shape index: {}]   ;;  %s1331_s2 = inlined_call_operand.vmem [shape: f32[2,1,128], index: 2, kind: input, shape index: {}]   ;;  %s1332_s3 = inlined_call_operand.hbm [shape: f32[2,4,128], index: 3, kind: input, shape index: {}]   ;;  %s1333_s4 = inlined_call_operand.vmem [shape: f32[2,1,1], index: 4, kind: output, shape index: {}]  }
   0x1   :  { %11 = vsyncpa [#allocation4 + $0x1], 0 }
   0x2   :  { %12 = vsyncpa [#allocation6], 0 }
   0x3   :  { %14 = vsyncpa [#allocation6 + $0x1], 0  ;;  %s1072_s15 = smov 0   ;;  %s1074_s16 = smov 0  }
   0x4   :  { %s1076_s17 = smov 0   ;;  %s1078_s18 = smov 0  }
   0x5   :  { %s1080_s19 = smov 0   ;;  %s1082_s20 = smov 0  }
   0x6 LB: > { %s714_s21 = sadd.s32 4294967295, %s1040_s20   ;;  %s32_s22 = sadd.s32 1, %s1036_s19  ;;  %s1040_s20 = sphi %s1082_s20, %s20_s20   ;;  %s1036_s19 = sphi %s1080_s19, %s1341_s19   ;;  %s1032_s18 = sphi %s1078_s18, %s1340_s18   ;;  %s1028_s17 = sphi %s1076_s17, %s1339_s17   ;;  %s1024_s16 = sphi %s1074_s16, %s1338_s16   ;;  %s1020_s15 = sphi %s1072_s15, %s1337_s15  }
   0x7   : > { %p34_p0 = scmp.ge.s32.totalorder %s32_s22, 2  ;;  %s41_s23 = sadd.s32 1, %s1028_s17 }
   0x8   : > { %p48_p1 = scmp.ne.s32.totalorder %s1028_s17, %s1024_s16  ;;  %p49_p2 = scmp.eq.s32.totalorder %s1040_s20, 0 }
   0x9   : > { %s1343_s22 = smov (%p34_p0, %s32_s22), 0  ;;  %p54_p4 = scmp.ne.s32.totalorder %s1024_s16, %s1020_s15 }
   0xa   : > { %p50_p3 = por %p49_p2, %p48_p1  ;;  %s36_s24 = ssub.s32 %s1036_s19, %s1343_s22 }
   0xb   : > { %p55_p5 = scmp.eq.s32.totalorder %s714_s21, 0  ;;  %p39_p6 = scmp.eq.s32.totalorder %s36_s24, 0 }
   0xc   : > { %p850_p8 = scmp.lt.s32.totalorder %s1040_s20, 2  ;;  %s1122_s27 = sand.u32 1, %s1028_s17  }
   0xd   : > { %p1113_p7 = por %p55_p5, %p54_p4  ;;  %s203_s29 = sand.u32 1, %s1040_s20  }
   0xe   : > { %s1119_s26 = scalar_select %p39_p6, %s1028_s17, %s41_s23  }
   0xf   : > { %p1124_p9 = pnand %p850_p8, %p50_p3  ;;  %s721_s30 = sshll.u32 %s1036_s19, 4 }
  0x10   : > { %s206_s5 = scalar_lea.vmem [#allocation5], %s1122_s27  ;;  %s211_s9 = scalar_lea.hbm %s1330_s1, %s721_s30 }
  0x11   : > { %s213_s6 = sshll.u32 %s206_s5, 4  ;;  %s1134_s10 = scalar_lea.sflag [#allocation6], %s203_s29  ;;  %s214_s6 = int_to_ptr.vmem [resolvable:$true] %s213_s6 }
  0x12   : > { %p904_p10 = pneg %p1124_p9  ;;  %s915_s11 = scalar_lea.vmem %s214_s6, 16 }
  0x13   : > { %p916_p11 = scmp.ne.s32.totalorder %s214_s6, %s915_s11  ;;  %s1042_s12 = smov [#allocation5]  }
  0x14   : > { %s920_s13 = sshll.u32 %s1042_s12, 4  ;;  %s921_s13 = int_to_ptr.vmem [resolvable:$false] %s920_s13 }
  0x15   : > { %p918_p12 = pnand %p916_p11, %p904_p10  ;;  %s922_s14 = scalar_lea.vmem %s921_s13, 32 }
  0x16   : > { %p923_p0 = scmp.lt.s32.totalorder %s214_s6, %s921_s13  ;;  %p924_p1 = scmp.lt.s32.totalorder %s922_s14, %s915_s11 }
  0x17   : > { %p919_p13 = pneg %p918_p12 }
  0x18   : > { %p925_p2 = por %p924_p1, %p923_p0 }
  0x1a   : > { %p926_p3 = pnand %p925_p2, %p919_p13 }
  0x1c   : > { %929 = shalt.err (!%p926_p3)
}
  0x1d   : > { %846 = dma.hbm_to_vmem [thread:$0]  (!%p1124_p9), %s211_s9, 16, %s214_s6, %s1134_s10  }
  0x1e   : > { %p724_p4 = scmp.ge.s32.totalorder %s1040_s20, 1  ;;  %p242_p5 = scmp.lt.s32.totalorder %s1040_s20, 3 }
  0x1f   : > { %s718_s23 = sshll.u32 %s1122_s27, 3  ;;  %s796_s24 = sshll.u32 %s1036_s19, 7 }
  0x20   : > { %p1146_p6 = pnand %p724_p4, %p242_p5  ;;  %s194_s5 = scalar_lea.hbm %s1329_s0, %s796_s24 }
  0x21   : > { %s186_s7 = scalar_lea.vmem [#allocation3], %s718_s23  ;;  %s722_s11 = sshll.u32 %s1122_s27, 2 }
  0x22   : > { %s196_s8 = sshll.u32 %s186_s7, 4  ;;  %s183_s12 = scalar_lea.sflag [#allocation4], %s1122_s27  ;;  %s197_s8 = int_to_ptr.vmem [resolvable:$true] %s196_s8 }
  0x23   : > { %s943_s13 = scalar_lea.vmem %s197_s8, 128  ;;  %s1043_s6 = smov [#allocation3]  }
  0x24   : > { %p944_p8 = scmp.ne.s32.totalorder %s197_s8, %s943_s13  ;;  %s948_s9 = sshll.u32 %s1043_s6, 4  ;;  %s949_s9 = int_to_ptr.vmem [resolvable:$false] %s948_s9 }
  0x25   : > { %s950_s14 = scalar_lea.vmem %s949_s9, 256  ;;  %p951_p13 = scmp.lt.s32.totalorder %s197_s8, %s949_s9 }
  0x26   : > { %p946_p11 = pnand %p944_p8, %p904_p10  ;;  %p952_p0 = scmp.lt.s32.totalorder %s950_s14, %s943_s13 }
  0x28   : > { %p947_p12 = pneg %p946_p11  ;;  %p953_p1 = por %p952_p0, %p951_p13 }
  0x2a   : > { %p954_p2 = pnand %p953_p1, %p947_p12 }
  0x2c   : > { %957 = shalt.err (!%p954_p2)
}
  0x2d   : > { %843 = dma.hbm_to_vmem [thread:$0]  (!%p1124_p9), %s194_s5, 128, %s197_s8, %s183_s12  }
  0x2e   : > { %s723_s27 = sshll.u32 %s1036_s19, 6  ;;  %s230_s23 = scalar_lea.vmem [#allocation7], %s722_s11 }
  0x2f   : > { %s237_s24 = sshll.u32 %s230_s23, 4  ;;  %s235_s7 = scalar_lea.hbm %s1332_s3, %s723_s27  ;;  %s238_s24 = int_to_ptr.vmem [resolvable:$true] %s237_s24 }
  0x30   : > { %s971_s6 = scalar_lea.vmem %s238_s24, 64  ;;  %s1044_s13 = smov [#allocation7]  }
  0x31   : > { %p972_p3 = scmp.ne.s32.totalorder %s238_s24, %s971_s6  ;;  %s976_s9 = sshll.u32 %s1044_s13, 4  ;;  %s977_s9 = int_to_ptr.vmem [resolvable:$false] %s976_s9 }
  0x32   : > { %s978_s14 = scalar_lea.vmem %s977_s9, 128  ;;  %p979_p8 = scmp.lt.s32.totalorder %s238_s24, %s977_s9 }
  0x33   : > { %p974_p4 = pnand %p972_p3, %p904_p10  ;;  %p980_p11 = scmp.lt.s32.totalorder %s978_s14, %s971_s6 }
  0x35   : > { %p975_p5 = pneg %p974_p4  ;;  %p981_p12 = por %p980_p11, %p979_p8 }
  0x37   : > { %p982_p13 = pnand %p981_p12, %p975_p5 }
  0x39   : > { %985 = shalt.err (!%p982_p13)
}
  0x3a   : > { %849 = dma.hbm_to_vmem [thread:$0]  (!%p1124_p9), %s235_s7, 64, %s238_s24, %s1134_s10  }
  0x3b   : > { %246 = sbr.rel (%p1146_p6) target bundleno = 526 (0x20e), region = 36  ;;  %s1175_s5 = sand.u32 (!%p1146_p6), 1, %s1024_s16  }
  0x3c   : > { %s725_s8 = sshll.u32 (!%p1146_p6), %s1175_s5, 3  ;;  %s249_s11 = scalar_lea.sflag (!%p1146_p6), [#allocation4], %s1175_s5 }
  0x3d   : > { %s1179_s12 = scalar_lea.vmem (!%p1146_p6), [#allocation3], %s725_s8 }
  0x40   : > { %1011 = dma.done.wait (%p1113_p7), %s249_s11, 128  }
  0x41   : > { %1013 = vsyncadd (%p1113_p7), %s249_s11, 4294967168  ;;  %s257_s28 = sand.u32 1, %s714_s21   ;;  %s260_s15 = scalar_lea.vmem [#allocation5], %s1175_s5 }
  0x42   : > { %s258_s10 = scalar_lea.sflag [#allocation6], %s257_s28 }
  0x43   : > { %1015 = dma.done.wait (%p1113_p7), %s258_s10, 80  }
  0x44   : > { %1017 = vsyncadd (%p1113_p7), %s258_s10, 4294967216  ;;  %v317_v0 = vlaneseq  ;;  %v1199_v7 = vld [vmem:[%s260_s15] ss:$0 sm:$0xff]  ;;  %v1045_v10 = vmov 1.0   ;;  %v1231_v19 = vld [vmem:[%s1179_s12] sm:$0xff]  ;;  %v1046_v37 = vmov 0.0  }
  0x45   : > { %v487_v23 = vcombine.high %v1231_v19, %v1231_v19  ;;  %315 = vst [vmem:[#allocation2] sm:$0xf] %v1046_v37  ;;  %p305_p7 = scmp.lt.s32.totalorder %s1032_s18, 1  ;;  %s726_s21 = sshll.u32 %s1175_s5, 2 }
  0x46   : > { %v1192_v1 = vshrl.u32 %v317_v0, 7  ;;  %s269_s24 = scalar_lea.vmem [#allocation7], %s726_s21 }
  0x47   : > { %553 = vmatprep.mubr.f32.mxu0 %v487_v23  ;;  %s1345_s18 = smov (!%p305_p7, %s1032_s18), 1  ;;  %v566_v43 = vld [vmem:[%s269_s24] sm:$0xf] }
  0x48   : > { %v349_v2 = vadd.s32 248, %v1192_v1  ;;  %v333_v3 = vadd.s32 120, %v1192_v1  ;;  %v348_v4 = vadd.s32 240, %v1192_v1  ;;  %v332_v5 = vadd.s32 112, %v1192_v1  ;;  %s307_s23 = scalar_lea.vmem %s1331_s2, %s1345_s18  ;;  %s310_s7 = scalar_lea.vmem %s1333_s4, %s1345_s18 }
  0x49   : > { %v347_v6 = vadd.s32 232, %v1192_v1  ;;  %v331_v8 = vadd.s32 104, %v1192_v1  ;;  %v346_v9 = vadd.s32 224, %v1192_v1  ;;  %v330_v11 = vadd.s32 96, %v1192_v1  ;;  %v792_v44 = vld [vmem:[%s307_s23] ss:$0 sm:$0xff] }
  0x4a   : > { %vm420_vm0 = vcmp.eq.s32.totalorder %v349_v2, %v1199_v7  ;;  %vm404_vm1 = vcmp.eq.s32.totalorder %v333_v3, %v1199_v7  ;;  %vm419_vm2 = vcmp.eq.s32.totalorder %v348_v4, %v1199_v7  ;;  %vm403_vm3 = vcmp.eq.s32.totalorder %v332_v5, %v1199_v7 }
  0x4b   : > { %797 = vmatprep.subr.msk.mxu0 %vm420_vm0, %v1045_v10  ;;  %vm418_vm4 = vcmp.eq.s32.totalorder %v347_v6, %v1199_v7  ;;  %v345_v12 = vadd.s32 216, %v1192_v1  ;;  %vm402_vm5 = vcmp.eq.s32.totalorder %v331_v8, %v1199_v7  ;;  %v329_v13 = vadd.s32 88, %v1192_v1 }
  0x4c   : > { %798 = vmatpush3.msk.msra.mxu0 %vm404_vm1, %v1045_v10  ;;  %vm417_vm6 = vcmp.eq.s32.totalorder %v346_v9, %v1199_v7  ;;  %v344_v14 = vadd.s32 208, %v1192_v1  ;;  %vm401_vm7 = vcmp.eq.s32.totalorder %v330_v11, %v1199_v7  ;;  %v328_v15 = vadd.s32 80, %v1192_v1  ;;  %v485_v39 = vld [vmem:[#allocation2] sm:$0xf] }
  0x4d   : > { %799 = vmatprep.subr.msk.mxu0 %vm419_vm2, %v1045_v10  ;;  %vm416_vm8 = vcmp.eq.s32.totalorder %v345_v12, %v1199_v7  ;;  %v343_v16 = vadd.s32 200, %v1192_v1  ;;  %vm400_vm9 = vcmp.eq.s32.totalorder %v329_v13, %v1199_v7  ;;  %v327_v17 = vadd.s32 72, %v1192_v1 }
  0x4e   : > { %800 = vmatpush3.msk.msra.mxu0 %vm403_vm3, %v1045_v10  ;;  %vm415_vm10 = vcmp.eq.s32.totalorder %v344_v14, %v1199_v7  ;;  %v342_v18 = vadd.s32 192, %v1192_v1  ;;  %vm399_vm11 = vcmp.eq.s32.totalorder %v328_v15, %v1199_v7  ;;  %v326_v20 = vadd.s32 64, %v1192_v1 }
  0x4f   : > { %801 = vmatprep.subr.msk.mxu0 %vm418_vm4, %v1045_v10  ;;  %vm414_vm12 = vcmp.eq.s32.totalorder %v343_v16, %v1199_v7  ;;  %v341_v21 = vadd.s32 184, %v1192_v1  ;;  %vm398_vm13 = vcmp.eq.s32.totalorder %v327_v17, %v1199_v7  ;;  %v325_v22 = vadd.s32 56, %v1192_v1 }
  0x50   : > { %802 = vmatpush3.msk.msra.mxu0 %vm402_vm5, %v1045_v10  ;;  %vm413_vm14 = vcmp.eq.s32.totalorder %v342_v18, %v1199_v7  ;;  %v340_v24 = vadd.s32 176, %v1192_v1  ;;  %vm397_vm15 = vcmp.eq.s32.totalorder %v326_v20, %v1199_v7  ;;  %v324_v25 = vadd.s32 48, %v1192_v1 }
  0x51   : > { %803 = vmatprep.subr.msk.mxu0 %vm417_vm6, %v1045_v10  ;;  %vm412_vm0 = vcmp.eq.s32.totalorder %v341_v21, %v1199_v7  ;;  %v339_v26 = vadd.s32 168, %v1192_v1  ;;  %vm396_vm1 = vcmp.eq.s32.totalorder %v325_v22, %v1199_v7  ;;  %v323_v27 = vadd.s32 40, %v1192_v1 }
  0x52   : > { %804 = vmatpush3.msk.msra.mxu0 %vm401_vm7, %v1045_v10  ;;  %vm411_vm2 = vcmp.eq.s32.totalorder %v340_v24, %v1199_v7  ;;  %v338_v28 = vadd.s32 160, %v1192_v1  ;;  %vm395_vm3 = vcmp.eq.s32.totalorder %v324_v25, %v1199_v7  ;;  %v322_v29 = vadd.s32 32, %v1192_v1 }
  0x53   : > { %805 = vmatprep.subr.msk.mxu0 %vm416_vm8, %v1045_v10  ;;  %vm410_vm4 = vcmp.eq.s32.totalorder %v339_v26, %v1199_v7  ;;  %v337_v30 = vadd.s32 152, %v1192_v1  ;;  %vm394_vm5 = vcmp.eq.s32.totalorder %v323_v27, %v1199_v7  ;;  %v321_v31 = vadd.s32 24, %v1192_v1 }
  0x54   : > { %806 = vmatpush3.msk.msra.mxu0 %vm400_vm9, %v1045_v10  ;;  %vm409_vm6 = vcmp.eq.s32.totalorder %v338_v28, %v1199_v7  ;;  %v336_v32 = vadd.s32 144, %v1192_v1  ;;  %vm393_vm7 = vcmp.eq.s32.totalorder %v322_v29, %v1199_v7  ;;  %v320_v33 = vadd.s32 16, %v1192_v1 }
  0x55   : > { %807 = vmatprep.subr.msk.mxu0 %vm415_vm10, %v1045_v10  ;;  %vm408_vm8 = vcmp.eq.s32.totalorder %v337_v30, %v1199_v7  ;;  %v335_v34 = vadd.s32 136, %v1192_v1  ;;  %vm392_vm9 = vcmp.eq.s32.totalorder %v321_v31, %v1199_v7  ;;  %v319_v35 = vadd.s32 8, %v1192_v1 }
  0x56   : > { %808 = vmatpush3.msk.msra.mxu0 %vm399_vm11, %v1045_v10  ;;  %vm407_vm10 = vcmp.eq.s32.totalorder %v336_v32, %v1199_v7  ;;  %v334_v36 = vadd.s32 128, %v1192_v1  ;;  %vm391_vm11 = vcmp.eq.s32.totalorder %v320_v33, %v1199_v7 }
  0x57   : > { %809 = vmatprep.subr.msk.mxu0 %vm414_vm12, %v1045_v10  ;;  %vm406_vm12 = vcmp.eq.s32.totalorder %v335_v34, %v1199_v7 }
  0x58   : > { %810 = vmatpush3.msk.msra.mxu0 %vm398_vm13, %v1045_v10  ;;  %vm390_vm13 = vcmp.eq.s32.totalorder %v319_v35, %v1199_v7 }
  0x59   : > { %811 = vmatprep.subr.msk.mxu0 %vm413_vm14, %v1045_v10  ;;  %vm405_vm14 = vcmp.eq.s32.totalorder %v334_v36, %v1199_v7 }
  0x5a   : > { %812 = vmatpush3.msk.msra.mxu0 %vm397_vm15, %v1045_v10  ;;  %vm389_vm15 = vcmp.eq.s32.totalorder %v1192_v1, %v1199_v7 }
  0x5b   : > { %813 = vmatprep.subr.msk.mxu0 %vm412_vm0, %v1045_v10 }
  0x5c   : > { %814 = vmatpush3.msk.msra.mxu0 %vm396_vm1, %v1045_v10  ;;  %vm581_vm1 = vcmask 1043456  }
  0x5d   : > { %815 = vmatprep.subr.msk.mxu0 %vm411_vm2, %v1045_v10  ;;  %vm593_vm2 = vcmask 0  }
  0x5e   : > { %816 = vmatpush3.msk.msra.mxu0 %vm395_vm3, %v1045_v10 }
  0x5f   : > { %817 = vmatprep.subr.msk.mxu0 %vm410_vm4, %v1045_v10 }
  0x60   : > { %818 = vmatpush3.msk.msra.mxu0 %vm394_vm5, %v1045_v10 }
  0x61   : > { %819 = vmatprep.subr.msk.mxu0 %vm409_vm6, %v1045_v10 }
  0x62   : > { %820 = vmatpush3.msk.msra.mxu0 %vm393_vm7, %v1045_v10 }
  0x63   : > { %821 = vmatprep.subr.msk.mxu0 %vm408_vm8, %v1045_v10 }
  0x64   : > { %822 = vmatpush3.msk.msra.mxu0 %vm392_vm9, %v1045_v10 }
  0x65   : > { %823 = vmatprep.subr.msk.mxu0 %vm407_vm10, %v1045_v10 }
  0x66   : > { %824 = vmatpush3.msk.msra.mxu0 %vm391_vm11, %v1045_v10 }
  0x67   : > { %825 = vmatprep.subr.msk.mxu0 %vm406_vm12, %v1045_v10 }
  0x68   : > { %826 = vmatpush3.msk.msra.mxu0 %vm390_vm13, %v1045_v10 }
  0x69   : > { %827 = vmatprep.subr.msk.mxu0 %vm405_vm14, %v1045_v10 }
  0x6a   : > { %828 = vmatpush3.msk.msra.mxu0 %vm389_vm15, %v1045_v10 }
  0x6b   : > { %554 = vmatmul.mubr.f32.vlgmr.msra.gmra.mxu0 %v1231_v19 }
 0x12b   : > { %v829_v38 = vpop.f32.mrf.mxu0 }
 0x12d   : > { %v830_v40 = vpop.f32.mrf.mxu0 }
 0x12e   : > { %v831_v41 = vadd.f32 %v830_v40, %v829_v38 }
 0x130   : > { %v559_v42 = vadd.f32 %v831_v41, %v485_v39 }
 0x132   : > { %560 = vst [vmem:[#allocation2] sm:$0xf] %v559_v42 }
 0x139   : > { %v565_v45 = vld [vmem:[#allocation2] sm:$0xf] }
 0x13a   : > { %v567_v46 = vsub.f32 %v565_v45, %v566_v43 }
 0x13c   : > { %v574_v47 = vmul.f32 %v792_v44, %v567_v46 }
 0x13e   : > { %v575_v48 = vand.u32 2147483647, %v574_v47  ;;  %v577_v49 = vmul.f32 0.5, %v574_v47 }
 0x140   : > { %vm576_vm0 = vcmp.lt.f32.partialorder %v575_v48, 1.0  ;;  %v578_v50 = vmul.f32 %v577_v49, %v574_v47  ;;  %v793_v51 = vadd.f32 -0.5, %v575_v48 }
 0x142   : > { %v580_v52 = vsel %vm576_vm0, %v578_v50, %v793_v51 }
 0x143   : > { %v582_v53 = vsel %vm581_vm1, %v580_v52, 0.0 }
 0x144   : > { %583 = vadd.xlane.f32.xlu0 %v582_v53 }
 0x1cd   : > { %v584_v54 = vpop.xlane.xlu0 %583 }
 0x1ce   : > { %v585_v55 = vrot.slane %v584_v54, 4 }
 0x1d0   : > { %v586_v56 = vadd.f32 %v585_v55, %v584_v54 }
 0x1d2   : > { %v587_v57 = vrot.slane %v586_v56, 2 }
 0x1d4   : > { %v588_v58 = vadd.f32 %v587_v57, %v586_v56 }
 0x1d6   : > { %v589_v59 = vrot.slane %v588_v58, 1 }
 0x1d8   : > { %v590_v60 = vadd.f32 %v589_v59, %v588_v58 }
 0x1da   : > { %832 = vpush %v590_v60 }
 0x20b   : > { %s833_s6 = spop %832 }
 0x20c   : > { %v592_v61 = vstv %s833_s6 }
 0x20d   : > { %594 = vst.msk [vmem:[%s310_s7] sm:$0x1] %vm593_vm2, %v592_v61 }
 0x20e PF: > { %s20_s20 = sadd.s32 1, %s1040_s20   ;;  %s1337_s15 = smov %s1024_s16 }
 0x20f   : > { %p17_p9 = scmp.ge.s32.totalorder %s20_s20, 4   ;;  %s1338_s16 = smov %s1028_s17 }
 0x210   : > { %s1339_s17 = smov %s1119_s26  ;;  %s1340_s18 = smov %s1036_s19 }
 0x211   : > { %s1341_s19 = smov %s1343_s22  ;;  %19 = sbr.rel (!%p17_p9) target bundleno = 6 (0x6), region = 111 }
 0x216   :  { %612 = vsyncpa [#allocation4], 1 }
 0x217   :  { %614 = vsyncpa [#allocation4 + $0x1], 1 }
 0x218   :  { %615 = vsyncpa [#allocation6], 1 }
 0x219   :  { %617 = vsyncpa [#allocation6 + $0x1], 1 }

</bundles_post_ra>
